<compile_context>
chip_gen: v5e
topology: v5e:2x2
jax: 0.10.0
libtpu: 0.0.40
codegen_flags: <defaults>
</compile_context>

<pallas_src>
import jax
import jax.numpy as jnp
from jax.experimental import pallas as pl
from jax.experimental.pallas import tpu as pltpu


_NEG_FILL = -1e30  # finite "-inf" used for masked (out-of-range) classes


def _round_up(x: int, m: int) -> int:
    return (x + m - 1) // m * m


def _derive_tiles(B: int, C: int, itemsize: int,
                  block_rows=None, block_classes=None):
    """Pick (row_tile, class_tile, vmem_limit) from the device's VMEM size."""
    sub = 16 if itemsize == 2 else 8  # sublane multiple (bf16 packs 2 rows)

    try:
        vmem_cap = int(pltpu.get_tpu_info().vmem_capacity_bytes)
    except Exception:  # interpret mode / no TPU info available
        vmem_cap = 64 * 1024 * 1024  # assume the smallest (v7x-like) VMEM

    # Working-set budget: 2x double-buffered input block + ~4 f32-sized
    # intermediates (upcast copy, iota, select, exp) per element.
    budget = min(vmem_cap // 4, 24 * 1024 * 1024)
    vmem_limit = int(min(vmem_cap // 2, 64 * 1024 * 1024))

    # Class tile: whole class axis if it is small (block dim == full array dim
    # is always legal), otherwise a lane-dense multiple of 128.
    tc_max = 2048 if block_classes is None else int(block_classes)
    if C <= tc_max:
        tc = C
    else:
        tc = max(128, (tc_max // 128) * 128)

    # Row tile: biggest multiple of `sub` whose working set fits the budget.
    per_row_bytes = tc * (2 * itemsize + 4 * 4)
    tb = budget // per_row_bytes
    tb = max(sub, (tb // sub) * sub)
    tb = min(tb, 4096)
    if block_rows is not None:
        tb = min(tb, max(sub, (int(block_rows) // sub) * sub))
    tb = min(tb, _round_up(B, sub))  # avoid over-padding small batches
    return tb, tc, vmem_limit


def _make_kernel(inv_t: float, tc: int, num_classes: int, mask_lanes: bool):
    """inv_t / tc / num_classes are Python scalars -> inlined as literals
    (no traced constants captured by the kernel closure)."""

    def kernel(logits_ref, targets_ref, loss_ref, m_sc, l_sc, p_sc):
        k = pl.program_id(1)  # class-tile index (reduction axis)

        @pl.when(k == 0)
        def _():
            m_sc[...] = jnp.full_like(m_sc, _NEG_FILL)
            l_sc[...] = jnp.zeros_like(l_sc)
            p_sc[...] = jnp.zeros_like(p_sc)

        # (tb, tc) tile, upcast to f32 in VMEM only; HBM traffic stays native.
        x = logits_ref[...].astype(jnp.float32) * inv_t

        # One shared iota: global class id for both the lane-validity mask and
        # the target one-hot pick.
        local_id = jax.lax.broadcasted_iota(jnp.int32, x.shape, 1)
        gid = local_id + k * tc
        if mask_lanes:  # only the last class tile can exceed C (trace-time)
            x = jnp.where(gid < num_classes, x, _NEG_FILL)

        # Target pick: single compare + select, accumulated across class tiles.
        tgt = targets_ref[...]  # (tb, 1) int32
        p_sc[...] += jnp.sum(jnp.where(gid == tgt, x, 0.0),
                             axis=-1, keepdims=True)

        # Online (flash-style) log-sum-exp update.
        m_prev = m_sc[...]
        m_new = jnp.maximum(m_prev, jnp.max(x, axis=-1, keepdims=True))
        l_sc[...] = (l_sc[...] * jnp.exp(m_prev - m_new)
                     + jnp.sum(jnp.exp(x - m_new), axis=-1, keepdims=True))
        m_sc[...] = m_new

        @pl.when(k == pl.num_programs(1) - 1)
        def _():
            loss_ref[...] = jnp.log(l_sc[...]) + m_sc[...] - p_sc[...]

    return kernel


def norm_softmax_loss(logits: jax.Array, targets: jax.Array,
                      temperature: float = 0.05,
                      block_rows=None, block_classes=None) -> jax.Array:
    """Pallas implementation of NormSoftmaxLoss.forward.

    logits:  [B, C] float array (f32 or bf16)
    targets: [B]    int class indices in [0, C)
    returns: scalar float32 mean cross entropy of logits / temperature
    """
    # TODO(synk): PyTorch CrossEntropyLoss ignore_index=-100 is not handled.
    B, C = logits.shape
    itemsize = jnp.dtype(logits.dtype).itemsize
    tb, tc, vmem_limit = _derive_tiles(B, C, itemsize, block_rows, block_classes)

    nb = pl.cdiv(B, tb)
    nc = pl.cdiv(C, tc)

    targets2d = targets.astype(jnp.int32).reshape(B, 1)  # tiny; no logits pad
    kernel = _make_kernel(1.0 / float(temperature), tc, C, (C % tc) != 0)

    per_row = pl.pallas_call(
        kernel,
        out_shape=jax.ShapeDtypeStruct((B, 1), jnp.float32),
        grid_spec=pltpu.PrefetchScalarGridSpec(
            num_scalar_prefetch=0,
            grid=(nb, nc),                                       # class axis last
            in_specs=[
                pl.BlockSpec((tb, tc), lambda i, k: (i, k)),     # logits tile
                pl.BlockSpec((tb, 1), lambda i, k: (i, 0)),      # targets tile
            ],
            out_specs=pl.BlockSpec((tb, 1), lambda i, k: (i, 0)),  # per-row loss
            scratch_shapes=[pltpu.VMEM((tb, 1), jnp.float32)] * 3,  # m, l, picked
        ),
        compiler_params=pltpu.CompilerParams(
            dimension_semantics=("parallel", "arbitrary"),
            vmem_limit_bytes=vmem_limit,
        ),
    )(logits, targets2d)

    # Partial edge blocks never write out-of-range rows, so (B,1) is exact.
    return jnp.sum(per_row[:, 0]) / B


class NormSoftmaxLoss:
    """Thin parity wrapper matching the PyTorch module's call signature."""

    def __init__(self, temperature: float = 0.05):
        self.temperature = temperature

    def __call__(self, logits, instance_targets):
        return norm_softmax_loss(logits, instance_targets, self.temperature)

    def __repr__(self):
        return f"NormSoftmaxLoss(temperature={self.temperature})"


def _reference_loss(logits, targets, temperature):
    x = logits.astype(jnp.float32) / temperature
    B = logits.shape[0]
    return jnp.mean(jax.nn.logsumexp(x, axis=-1) - x[jnp.arange(B), targets])


if __name__ == "__main__":
    key = jax.random.PRNGKey(0)
    k1, k2, k3, k4, k5, k6 = jax.random.split(key, 6)

    # Case 1: small aligned shapes (single class tile, single row tile).
    B1, C1 = 8, 32
    logits1 = jax.random.normal(k1, (B1, C1), dtype=jnp.float32)
    targets1 = jax.random.randint(k2, (B1,), 0, C1, dtype=jnp.int32)
    loss1 = jax.block_until_ready(norm_softmax_loss(logits1, targets1, temperature=0.05))
    ref1 = _reference_loss(logits1, targets1, 0.05)
    assert jnp.allclose(loss1, ref1, rtol=1e-4, atol=1e-3), (loss1, ref1)

    # Case 2: ragged batch + class-tiled online LSE with a partial last class
    # tile (B=10 with tb=8 -> 2 row tiles, last partial; C=200 with tc=128 ->
    # 2 class tiles, last masked in-kernel).
    B2, C2 = 10, 200
    logits2 = jax.random.normal(k3, (B2, C2), dtype=jnp.float32)
    targets2 = jax.random.randint(k4, (B2,), 0, C2, dtype=jnp.int32)
    loss2 = jax.block_until_ready(
        norm_softmax_loss(logits2, targets2, temperature=0.05,
                          block_rows=8, block_classes=128))
    ref2 = _reference_loss(logits2, targets2, 0.05)
    assert jnp.allclose(loss2, ref2, rtol=1e-4, atol=1e-3), (loss2, ref2)

    # Case 3: bf16 inputs flow through in native dtype (upcast only in VMEM).
    B3, C3 = 16, 384
    logits3 = jax.random.normal(k5, (B3, C3), dtype=jnp.bfloat16)
    targets3 = jax.random.randint(k6, (B3,), 0, C3, dtype=jnp.int32)
    loss3 = jax.block_until_ready(norm_softmax_loss(logits3, targets3, temperature=0.05))
    ref3 = _reference_loss(logits3, targets3, 0.05)
    assert jnp.allclose(loss3, ref3, rtol=1e-3, atol=1e-2), (loss3, ref3)

    print("KERNEL_OK")
</pallas_src>

<mosaic_0001>
module attributes {stable_mosaic.version = 11 : i64} {
  func.func @kernel(%arg0: i32, %arg1: i32, %arg2: memref<8x32xf32, #tpu.memory_space<vmem>>, %arg3: memref<8x1xi32, #tpu.memory_space<vmem>>, %arg4: memref<8x1xf32, #tpu.memory_space<vmem>>, %arg5: memref<8x1xf32, #tpu.memory_space<vmem>>, %arg6: memref<8x1xf32, #tpu.memory_space<vmem>>, %arg7: memref<8x1xf32, #tpu.memory_space<vmem>>) attributes {dimension_semantics = [#tpu.dimension_semantics<parallel>, #tpu.dimension_semantics<arbitrary>], iteration_bounds = array<i64: 1, 1>, scalar_prefetch = 0 : i64, scratch_operands = 3 : i64, tpu.core_type = #tpu.core_type<tc>, window_params = [{transform_indices = @transform_0, window_bounds = array<i64: 8, 32>}, {transform_indices = @transform_1, window_bounds = array<i64: 8, 1>}, {transform_indices = @transform_2, window_bounds = array<i64: 8, 1>}]} {
    %c0_i32 = arith.constant 0 : i32
    %0 = arith.cmpi eq, %arg1, %c0_i32 : i32
    %1 = arith.extui %0 : i1 to i32
    %c0_i32_0 = arith.constant 0 : i32
    %2 = arith.cmpi ne, %1, %c0_i32_0 : i32
    scf.if %2 {
      %cst_22 = arith.constant -1.000000e+30 : f32
      %39 = vector.broadcast %cst_22 : f32 to vector<8x1xf32>
      %c0_23 = arith.constant 0 : index
      %c0_24 = arith.constant 0 : index
      %40 = vector.load %arg5[%c0_23, %c0_24] : memref<8x1xf32, #tpu.memory_space<vmem>>, vector<8x1xf32>
      tpu.vector_store %arg5[%c0_23, %c0_24], %39 {strides = array<i32>} : memref<8x1xf32, #tpu.memory_space<vmem>>, vector<8x1xf32>,
      %cst_25 = arith.constant 0.000000e+00 : f32
      %41 = vector.broadcast %cst_25 : f32 to vector<8x1xf32>
      %c0_26 = arith.constant 0 : index
      %c0_27 = arith.constant 0 : index
      %42 = vector.load %arg6[%c0_26, %c0_27] : memref<8x1xf32, #tpu.memory_space<vmem>>, vector<8x1xf32>
      tpu.vector_store %arg6[%c0_26, %c0_27], %41 {strides = array<i32>} : memref<8x1xf32, #tpu.memory_space<vmem>>, vector<8x1xf32>,
      %cst_28 = arith.constant 0.000000e+00 : f32
      %43 = vector.broadcast %cst_28 : f32 to vector<8x1xf32>
      %c0_29 = arith.constant 0 : index
      %c0_30 = arith.constant 0 : index
      %44 = vector.load %arg7[%c0_29, %c0_30] : memref<8x1xf32, #tpu.memory_space<vmem>>, vector<8x1xf32>
      tpu.vector_store %arg7[%c0_29, %c0_30], %43 {strides = array<i32>} : memref<8x1xf32, #tpu.memory_space<vmem>>, vector<8x1xf32>,
    } else {
    }
    %c0 = arith.constant 0 : index
    %c0_1 = arith.constant 0 : index
    %3 = vector.load %arg2[%c0, %c0_1] : memref<8x32xf32, #tpu.memory_space<vmem>>, vector<8x32xf32>
    %cst = arith.constant 2.000000e+01 : f32
    %4 = vector.broadcast %cst : f32 to vector<8x32xf32>
    %5 = arith.mulf %3, %4 : vector<8x32xf32>
    %6 = tpu.iota {dimensions = array<i32: 1>} : vector<8x32xi32>
    %c32_i32 = arith.constant 32 : i32
    %7 = arith.muli %arg1, %c32_i32 : i32
    %8 = vector.broadcast %7 : i32 to vector<8x32xi32>
    %9 = arith.addi %6, %8 : vector<8x32xi32>
    %c0_2 = arith.constant 0 : index
    %c0_3 = arith.constant 0 : index
    %10 = vector.load %arg3[%c0_2, %c0_3] : memref<8x1xi32, #tpu.memory_space<vmem>>, vector<8x1xi32>
    %c0_4 = arith.constant 0 : index
    %c0_5 = arith.constant 0 : index
    %11 = vector.load %arg7[%c0_4, %c0_5] : memref<8x1xf32, #tpu.memory_space<vmem>>, vector<8x1xf32>
    %12 = vector.broadcast %10 : vector<8x1xi32> to vector<8x32xi32>
    %13 = arith.cmpi eq, %9, %12 : vector<8x32xi32>
    %cst_6 = arith.constant 0.000000e+00 : f32
    %14 = vector.broadcast %cst_6 : f32 to vector<8x32xf32>
    %15 = arith.select %13, %5, %14 : vector<8x32xi1>, vector<8x32xf32>
    %cst_7 = arith.constant dense<0.000000e+00> : vector<8xf32>
    %16 = vector.multi_reduction <add>, %15, %cst_7 [1] : vector<8x32xf32> to vector<8xf32>
    %17 = vector.shape_cast %16 : vector<8xf32> to vector<8x1xf32>
    %18 = arith.addf %11, %17 : vector<8x1xf32>
    %c0_8 = arith.constant 0 : index
    %c0_9 = arith.constant 0 : index
    %19 = vector.load %arg7[%c0_8, %c0_9] : memref<8x1xf32, #tpu.memory_space<vmem>>, vector<8x1xf32>
    tpu.vector_store %arg7[%c0_8, %c0_9], %18 {strides = array<i32>} : memref<8x1xf32, #tpu.memory_space<vmem>>, vector<8x1xf32>,
    %c0_10 = arith.constant 0 : index
    %c0_11 = arith.constant 0 : index
    %20 = vector.load %arg5[%c0_10, %c0_11] : memref<8x1xf32, #tpu.memory_space<vmem>>, vector<8x1xf32>
    %cst_12 = arith.constant dense<0xFF800000> : vector<8xf32>
    %21 = vector.multi_reduction <maximumf>, %5, %cst_12 [1] : vector<8x32xf32> to vector<8xf32>
    %22 = vector.shape_cast %21 : vector<8xf32> to vector<8x1xf32>
    %23 = arith.maximumf %20, %22 : vector<8x1xf32>
    %c0_13 = arith.constant 0 : index
    %c0_14 = arith.constant 0 : index
    %24 = vector.load %arg6[%c0_13, %c0_14] : memref<8x1xf32, #tpu.memory_space<vmem>>, vector<8x1xf32>
    %25 = arith.subf %20, %23 : vector<8x1xf32>
    %26 = math.exp %25 : vector<8x1xf32>
    %27 = arith.mulf %24, %26 : vector<8x1xf32>
    %28 = vector.broadcast %23 : vector<8x1xf32> to vector<8x32xf32>
    %29 = arith.subf %5, %28 : vector<8x32xf32>
    %30 = math.exp %29 : vector<8x32xf32>
    %cst_15 = arith.constant dense<0.000000e+00> : vector<8xf32>
    %31 = vector.multi_reduction <add>, %30, %cst_15 [1] : vector<8x32xf32> to vector<8xf32>
    %32 = vector.shape_cast %31 : vector<8xf32> to vector<8x1xf32>
    %33 = arith.addf %27, %32 : vector<8x1xf32>
    %c0_16 = arith.constant 0 : index
    %c0_17 = arith.constant 0 : index
    %34 = vector.load %arg6[%c0_16, %c0_17] : memref<8x1xf32, #tpu.memory_space<vmem>>, vector<8x1xf32>
    tpu.vector_store %arg6[%c0_16, %c0_17], %33 {strides = array<i32>} : memref<8x1xf32, #tpu.memory_space<vmem>>, vector<8x1xf32>,
    %c0_18 = arith.constant 0 : index
    %c0_19 = arith.constant 0 : index
    %35 = vector.load %arg5[%c0_18, %c0_19] : memref<8x1xf32, #tpu.memory_space<vmem>>, vector<8x1xf32>
    tpu.vector_store %arg5[%c0_18, %c0_19], %23 {strides = array<i32>} : memref<8x1xf32, #tpu.memory_space<vmem>>, vector<8x1xf32>,
    %c0_i32_20 = arith.constant 0 : i32
    %36 = arith.cmpi eq, %arg1, %c0_i32_20 : i32
    %37 = arith.extui %36 : i1 to i32
    %c0_i32_21 = arith.constant 0 : i32
    %38 = arith.cmpi ne, %37, %c0_i32_21 : i32
    scf.if %38 {
      %c0_22 = arith.constant 0 : index
      %c0_23 = arith.constant 0 : index
      %39 = vector.load %arg6[%c0_22, %c0_23] : memref<8x1xf32, #tpu.memory_space<vmem>>, vector<8x1xf32>
      %40 = math.log %39 : vector<8x1xf32>
      %c0_24 = arith.constant 0 : index
      %c0_25 = arith.constant 0 : index
      %41 = vector.load %arg5[%c0_24, %c0_25] : memref<8x1xf32, #tpu.memory_space<vmem>>, vector<8x1xf32>
      %42 = arith.addf %40, %41 : vector<8x1xf32>
      %c0_26 = arith.constant 0 : index
      %c0_27 = arith.constant 0 : index
      %43 = vector.load %arg7[%c0_26, %c0_27] : memref<8x1xf32, #tpu.memory_space<vmem>>, vector<8x1xf32>
      %44 = arith.subf %42, %43 : vector<8x1xf32>
      %c0_28 = arith.constant 0 : index
      %c0_29 = arith.constant 0 : index
      %45 = vector.load %arg4[%c0_28, %c0_29] : memref<8x1xf32, #tpu.memory_space<vmem>>, vector<8x1xf32>
      tpu.vector_store %arg4[%c0_28, %c0_29], %44 {strides = array<i32>} : memref<8x1xf32, #tpu.memory_space<vmem>>, vector<8x1xf32>,
    } else {
    }
    return
  }
  func.func @transform_0(%arg0: i32, %arg1: i32) -> (i32, i32) {
    %c0_i32 = arith.constant 0 : i32
    return %arg0, %arg1 : i32, i32
  }
  func.func @transform_1(%arg0: i32, %arg1: i32) -> (i32, i32) {
    %c0_i32 = arith.constant 0 : i32
    %c0_i32_0 = arith.constant 0 : i32
    return %arg0, %c0_i32 : i32, i32
  }
  func.func @transform_2(%arg0: i32, %arg1: i32) -> (i32, i32) {
    %c0_i32 = arith.constant 0 : i32
    %c0_i32_0 = arith.constant 0 : i32
    return %arg0, %c0_i32 : i32, i32
  }
}

</mosaic_0001>

<bundles_post_ra>
// kernel: tpu_custom_call.1
= control target key start
LH: loop header
LB: loop body
LE: loop exit
PB: predicated region body
PF: predicated region fallthrough
CT: control target
= control target key end

     0   :  { %vm15_vm0 = vcmask 7168   ;;  %vm33_vm1 = vcmask 261120   ;;  %v90_v1 = vmov -1e+30   ;;  %v91_v4 = vmov 0   ;;  %s127_s0 = inlined_call_operand.vmem [shape: f32[8,32], index: 0, kind: input, shape index: {}]   ;;  %s128_s1 = inlined_call_operand.vmem [shape: s32[8,1], index: 1, kind: input, shape index: {}]   ;;  %s129_s2 = inlined_call_operand.vmem [shape: f32[8,1], index: 2, kind: output, shape index: {}]  }
   0x1   :  { %v19_v0 = vld [vmem:[%s127_s0] sm:$0xff]  ;;  %16 = vst.msk [vmem:[#allocation2] sm:$0xff] %vm15_vm0, %v90_v1  ;;  %82 = vset.pattern.permute.xlu0 %v91_v4  ;;  %83 = vset.pattern.permute.xlu1 %v91_v4  ;;  %v92_v5 = vmov 0.0   ;;  %v21_v11 = vlaneseq }
   0x2   :  { %v20_v2 = vmul.f32 20.0, %v19_v0  ;;  %17 = vst.msk [vmem:[#allocation3] sm:$0xff] %vm15_vm0, %v92_v5  ;;  %v26_v6 = vld [vmem:[%s128_s1] sm:$0xff] }
   0x3   :  { %18 = vst.msk [vmem:[#allocation4] sm:$0xff] %vm15_vm0, %v92_v5  ;;  %29 = vperm.xlu1 %83, %v26_v6   ;;  %v22_v13 = vand.u32 127, %v21_v11 }
   0x4   :  { %v41_v3 = vsel %vm33_vm1, %v20_v2, -inf }
   0x5   :  { %42 = vmax.xlane.f32.xlu0 %v41_v3 }
   0x8   :  { %v40_v7 = vld [vmem:[#allocation2] sm:$0xff] }
   0x9   :  { %v45_v26 = vld [vmem:[#allocation3] sm:$0xff] }
   0xa   :  { %v27_v21 = vld [vmem:[#allocation4] sm:$0xff] }
  0x75   :  { %v30_v12 = vpop.permute.xlu1 %29 }
  0x76   :  { %vm31_vm2 = vcmp.eq.s32.totalorder %v22_v13, %v30_v12 }
  0x77   :  { %v32_v14 = vsel %vm31_vm2, %v20_v2, 0.0 }
  0x78   :  { %v43_v8 = vpop.xlane.xlu0 %42  ;;  %v34_v15 = vsel %vm33_vm1, %v32_v14, 0.0 }
  0x79   :  { %v44_v9 = vmax.f32 %v40_v7, %v43_v8  ;;  %35 = vadd.xlane.f32.xlu2 %v34_v15 }
  0x7b   :  { %v46_v10 = vsub.f32 %v40_v7, %v44_v9  ;;  %63 = vst.msk [vmem:[#allocation2] sm:$0xff] %vm15_vm0, %v44_v9  ;;  %52 = vperm.xlu0 %82, %v44_v9  }
  0x7d   :  { %v47_v24 = vmul.f32 1.442695, %v46_v10 }
  0x82   :  { %v70_v33 = vld [vmem:[#allocation2] sm:$0xff] }
  0xec   :  { %v36_v22 = vpop.xlane.xlu2 %35 }
  0xed   :  { %v53_v16 = vpop.permute.xlu0 %52  ;;  %v37_v23 = vadd.f32 %v36_v22, %v27_v21 }
  0xee   :  { %v55_v17 = vsub.f32 %v20_v2, %v53_v16 }
  0xef   :  { %39 = vst.msk [vmem:[#allocation4] sm:$0xff] %vm15_vm0, %v37_v23 }
  0xf0   :  { %v56_v18 = vmul.f32 1.442695, %v55_v17 }
  0xf2   :  { %84 = vpow2.f32 %v56_v18 }
  0xf3   :  { %86 = vpow2.f32 %v47_v24 }
  0xf6   :  { %v72_v34 = vld [vmem:[#allocation4] sm:$0xff] }
  0xf8   :  { %v85_v19 = vpop.eup %84 }
  0xf9   :  { %v58_v20 = vsel %vm33_vm1, %v85_v19, 0.0  ;;  %v87_v25 = vpop.eup %86 }
  0xfa   :  { %59 = vadd.xlane.f32.xlu1 %v58_v20  ;;  %v49_v27 = vmul.f32 %v87_v25, %v45_v26 }
 0x16d   :  { %v60_v28 = vpop.xlane.xlu1 %59 }
 0x16e   :  { %v61_v29 = vadd.f32 %v60_v28, %v49_v27 }
 0x170   :  { %62 = vst.msk [vmem:[#allocation3] sm:$0xff] %vm15_vm0, %v61_v29 }
 0x177   :  { %v67_v30 = vld [vmem:[#allocation3] sm:$0xff] }
 0x178   :  { %88 = vlog2.f32 %v67_v30 }
 0x17e   :  { %v89_v31 = vpop.eup %88 }
 0x17f   :  { %v69_v32 = vmul.f32 0.6931472, %v89_v31 }
 0x181   :  { %v71_v35 = vadd.f32 %v70_v33, %v69_v32 }
 0x183   :  { %v73_v36 = vsub.f32 %v71_v35, %v72_v34 }
 0x185   :  { %74 = vst.msk [vmem:[%s129_s2] sm:$0xff] %vm15_vm0, %v73_v36 }

</bundles_post_ra>
